<compile_context>
chip_gen: v7x
topology: tpu7x:2x2x1
jax: 0.10.0
libtpu: 0.0.40
codegen_flags: <defaults>
</compile_context>

<pallas_src>
import numpy as np
import jax
import jax.numpy as jnp
from jax.experimental import pallas as pl
from jax.experimental.pallas import tpu as pltpu


def _round_up(n, m):
    return ((n + m - 1) // m) * m


# ----------------------------- Pallas kernel --------------------------------
def dcn_ffm_kernel(ffm_a_ref, ffm_b_ref, lin_w_ref, embed_ref,
                   cross_w_ref, cross_b_ref,
                   w0_ref, b0_ref, w1_ref, b1_ref,
                   cd_w_ref, scales_ref, out_ref):
    # All batch-sliced refs are laid out (feature, TB): batch on the lane axis.

    # ---- FFM second-order term: reduce over (pairs x ffm_embed_dim) rows ----
    ffm_term = jnp.sum(ffm_a_ref[...] * ffm_b_ref[...], axis=0, keepdims=True)  # (1,TB)

    # ---- FFM linear term (bias folded into an SMEM scalar) ----
    ffm_li = jnp.sum(lin_w_ref[...], axis=0, keepdims=True)                     # (1,TB)

    # ---- Cross network: x <- x0 * (x . w_i) + b_i + x ----
    x0 = embed_ref[...]                                                         # (D,TB)
    cw = cross_w_ref[...]                                                       # (D,L)
    cb = cross_b_ref[...]                                                       # (D,L)
    x = x0
    num_cross_layers = cw.shape[1]
    for i in range(num_cross_layers):
        w_i = cw[:, i:i + 1]                                                    # (D,1)
        b_i = cb[:, i:i + 1]                                                    # (D,1)
        xw = jnp.sum(x * w_i, axis=0, keepdims=True)                            # (1,TB)
        x = x0 * xw + b_i + x

    # ---- MLP: (Linear -> ReLU) x 2, weights pre-transposed to (out, in) ----
    h = jnp.dot(w0_ref[...], x, preferred_element_type=jnp.float32) + b0_ref[...]
    h = jnp.maximum(h, 0.0)                                                     # (H0,TB)
    h = jnp.dot(w1_ref[...], h, preferred_element_type=jnp.float32) + b1_ref[...]
    h = jnp.maximum(h, 0.0)                                                     # (H1,TB)

    # ---- cd_linear + final Linear(2,1), folded: cd_w pre-scaled by fin_w[0,1] ----
    p = jnp.sum(cd_w_ref[...] * h, axis=0, keepdims=True)                       # (1,TB)

    ffm_scale = scales_ref[0]          # fin_w[0, 0]
    bias_term = scales_ref[1]          # fin_w[0, 0] * lin_bias
    out_ref[...] = ffm_scale * (ffm_li + ffm_term) + bias_term + p              # (1,TB)


# ------------------------------- wrapper -------------------------------------
def dcn_with_ffm_forward(x_idx, params, *, tile_b=1024):
    """x_idx: int32 (B, num_fields) raw per-field indices."""
    B, F = x_idx.shape
    d_ffm = params["ffm_tables"].shape[-1]
    d_dcn = params["dcn_table"].shape[-1]
    D = F * d_dcn

    # Batch tile: lane-dense (multiple of 128); pad batch to a whole number of tiles.
    TB = min(tile_b, _round_up(B, 128))
    B_pad = _round_up(B, TB)
    if B_pad != B:
        pad = jnp.zeros((B_pad - B, F), x_idx.dtype)    # index 0 is valid in every field
        x_idx = jnp.concatenate([x_idx, pad], axis=0)

    xi = x_idx + params["offsets"][None, :]                                     # (B_pad,F)

    # ---- vectorized FFM pair gather (only the F*(F-1)/2 needed combos) ----
    pi_np, pj_np = np.triu_indices(F, k=1)
    pi = jnp.asarray(pi_np, jnp.int32)                                          # (P,)
    pj = jnp.asarray(pj_np, jnp.int32)
    P = int(pi_np.shape[0])

    # a[p, b, :] = table_{pj[p]}(feature at field pi[p])   (torch: xs[j][:, i])
    a = params["ffm_tables"][pj[:, None], xi[:, pi].T, :]                       # (P,B_pad,d)
    # b[p, b, :] = table_{pi[p]}(feature at field pj[p])   (torch: xs[i][:, j])
    b = params["ffm_tables"][pi[:, None], xi[:, pj].T, :]                       # (P,B_pad,d)
    ffm_a = jnp.transpose(a, (0, 2, 1)).reshape(P * d_ffm, B_pad)               # (P*d,B_pad)
    ffm_b = jnp.transpose(b, (0, 2, 1)).reshape(P * d_ffm, B_pad)

    # FeaturesLinear gathered weights, batch-on-lanes
    lin_w = params["lin_table"][xi, 0].T                                        # (F,B_pad)

    # DCN embedding, flattened with batch on lanes: embed[f*d+k, b]
    emb = params["dcn_table"][xi]                                               # (B_pad,F,d)
    embed_x = jnp.transpose(emb, (1, 2, 0)).reshape(D, B_pad)                   # (D,B_pad)

    # Fold final Linear(2,1) + FFM-linear bias into scalars / scaled cd weight.
    fin_w = params["fin_w"]                                                     # (1,2)
    ffm_scale = fin_w[0, 0]
    bias_term = ffm_scale * params["lin_bias"][0, 0]
    scales = jnp.stack([ffm_scale, bias_term]).astype(jnp.float32)              # (2,) SMEM
    cd_w_scaled = (params["cd_w"][:, 0] * fin_w[0, 1])[:, None]                 # (H1,1)

    # Resident weights, pre-transposed for the (feature, batch) layout.
    cross_w_t = params["cross_w"].T                                             # (D,L)
    cross_b_t = params["cross_b"].T                                             # (D,L)
    w0_t = params["mlp_w0"].T                                                   # (H0,D)
    b0 = params["mlp_b0"].T                                                     # (H0,1)
    w1_t = params["mlp_w1"].T                                                   # (H1,H0)
    b1 = params["mlp_b1"].T                                                     # (H1,1)

    num_tiles = B_pad // TB

    def batch_spec(rows):
        return pl.BlockSpec((rows, TB), lambda i: (0, i))

    def weight_spec(shape):
        return pl.BlockSpec(shape, lambda i: (0, 0))

    out = pl.pallas_call(
        dcn_ffm_kernel,
        out_shape=jax.ShapeDtypeStruct((1, B_pad), jnp.float32),
        grid=(num_tiles,),
        in_specs=[
            batch_spec(P * d_ffm),                                   # ffm_a
            batch_spec(P * d_ffm),                                   # ffm_b
            batch_spec(F),                                           # lin_w
            batch_spec(D),                                           # embed_x
            weight_spec(cross_w_t.shape),                            # cross_w
            weight_spec(cross_b_t.shape),                            # cross_b
            weight_spec(w0_t.shape),                                 # mlp_w0^T
            weight_spec(b0.shape),                                   # mlp_b0
            weight_spec(w1_t.shape),                                 # mlp_w1^T
            weight_spec(b1.shape),                                   # mlp_b1
            weight_spec(cd_w_scaled.shape),                          # cd_w * fin_w[0,1]
            pl.BlockSpec(memory_space=pltpu.MemorySpace.SMEM),       # scalars
        ],
        out_specs=pl.BlockSpec((1, TB), lambda i: (0, i)),
        compiler_params=pltpu.CompilerParams(
            dimension_semantics=("parallel",)),
    )(ffm_a, ffm_b, lin_w, embed_x,
      cross_w_t, cross_b_t, w0_t, b0, w1_t, b1, cd_w_scaled, scales)

    return out[0, :B]                                                           # (B,)


# ----------------------- pure-JAX reference (sanity) --------------------------
def reference_forward(x_idx, params):
    B, F = x_idx.shape
    xi = x_idx + params["offsets"][None, :]
    xs_all = params["ffm_tables"][:, xi, :]
    ffm_term = jnp.zeros((B,), jnp.float32)
    for i in range(F - 1):
        for j in range(i + 1, F):
            ffm_term = ffm_term + jnp.sum(xs_all[j, :, i, :] * xs_all[i, :, j, :], axis=1)
    ffm_li = jnp.sum(params["lin_table"][xi, 0], axis=1, keepdims=True) + params["lin_bias"]
    ffm_x = ffm_li + ffm_term[:, None]
    x0 = params["dcn_table"][xi].reshape(B, -1)
    x = x0
    for i in range(params["cross_w"].shape[0]):
        xw = jnp.sum(x * params["cross_w"][i][None, :], axis=1, keepdims=True)
        x = x0 * xw + params["cross_b"][i][None, :] + x
    h = jnp.maximum(x @ params["mlp_w0"] + params["mlp_b0"], 0.0)
    h = jnp.maximum(h @ params["mlp_w1"] + params["mlp_b1"], 0.0)
    p = h @ params["cd_w"]
    out = ffm_x * params["fin_w"][:, 0:1] + p * params["fin_w"][:, 1:2]
    return out[:, 0]


# --------------------------------- main ---------------------------------------
if __name__ == "__main__":
    # Small, DCNwithFFM-consistent config
    field_dims = [10, 12, 8, 6]
    F = len(field_dims)
    total = sum(field_dims)
    B = 200                         # exercises padding + 2 batch tiles (TB=128)
    ffm_embed_dim = 8
    dcn_embed_dim = 8
    D = F * dcn_embed_dim           # embed_output_dim = 32
    cross_layer_num = 3
    mlp_dims = (32, 16)

    key = jax.random.PRNGKey(0)
    ks = jax.random.split(key, 12)

    params = {
        "offsets": jnp.array(np.concatenate([[0], np.cumsum(field_dims)[:-1]]), jnp.int32),
        "ffm_tables": 0.1 * jax.random.normal(ks[0], (F, total, ffm_embed_dim), jnp.float32),
        "lin_table": 0.1 * jax.random.normal(ks[1], (total, 1), jnp.float32),
        "lin_bias": 0.1 * jax.random.normal(ks[2], (1, 1), jnp.float32),
        "dcn_table": 0.1 * jax.random.normal(ks[3], (total, dcn_embed_dim), jnp.float32),
        "cross_w": 0.1 * jax.random.normal(ks[4], (cross_layer_num, D), jnp.float32),
        "cross_b": 0.01 * jax.random.normal(ks[5], (cross_layer_num, D), jnp.float32),
        "mlp_w0": 0.1 * jax.random.normal(ks[6], (D, mlp_dims[0]), jnp.float32),
        "mlp_b0": 0.01 * jax.random.normal(ks[7], (1, mlp_dims[0]), jnp.float32),
        "mlp_w1": 0.1 * jax.random.normal(ks[8], (mlp_dims[0], mlp_dims[1]), jnp.float32),
        "mlp_b1": 0.01 * jax.random.normal(ks[9], (1, mlp_dims[1]), jnp.float32),
        "cd_w": 0.1 * jax.random.normal(ks[10], (mlp_dims[1], 1), jnp.float32),
        "fin_w": 0.1 * jax.random.normal(ks[11], (1, 2), jnp.float32),
    }

    # Deterministic integer input x: (B, num_fields), index within each field.
    idx_keys = jax.random.split(jax.random.PRNGKey(42), F)
    x_idx = jnp.stack(
        [jax.random.randint(idx_keys[f], (B,), 0, field_dims[f], dtype=jnp.int32)
         for f in range(F)], axis=1)

    out = dcn_with_ffm_forward(x_idx, params, tile_b=128)
    out = jax.block_until_ready(out)

    ref = reference_forward(x_idx, params)
    assert out.shape == (B,)
    assert np.allclose(np.asarray(out), np.asarray(ref), rtol=1e-4, atol=1e-5)

    print("KERNEL_OK")
</pallas_src>

<mosaic_0001>
module attributes {stable_mosaic.version = 11 : i64} {
  func.func @dcn_ffm_kernel(%arg0: i32, %arg1: memref<48x128xf32, #tpu.memory_space<vmem>>, %arg2: memref<48x128xf32, #tpu.memory_space<vmem>>, %arg3: memref<4x128xf32, #tpu.memory_space<vmem>>, %arg4: memref<32x128xf32, #tpu.memory_space<vmem>>, %arg5: memref<32x3xf32, #tpu.memory_space<vmem>>, %arg6: memref<32x3xf32, #tpu.memory_space<vmem>>, %arg7: memref<32x32xf32, #tpu.memory_space<vmem>>, %arg8: memref<32x1xf32, #tpu.memory_space<vmem>>, %arg9: memref<16x32xf32, #tpu.memory_space<vmem>>, %arg10: memref<16x1xf32, #tpu.memory_space<vmem>>, %arg11: memref<16x1xf32, #tpu.memory_space<vmem>>, %arg12: memref<2xf32, #tpu.memory_space<smem>>, %arg13: memref<1x128xf32, #tpu.memory_space<vmem>>) attributes {dimension_semantics = [#tpu.dimension_semantics<parallel>], iteration_bounds = array<i64: 2>, scalar_prefetch = 0 : i64, scratch_operands = 0 : i64, tpu.core_type = #tpu.core_type<tc>, window_params = [{transform_indices = @transform_0, window_bounds = array<i64: 48, 128>}, {transform_indices = @transform_1, window_bounds = array<i64: 48, 128>}, {transform_indices = @transform_2, window_bounds = array<i64: 4, 128>}, {transform_indices = @transform_3, window_bounds = array<i64: 32, 128>}, {pipeline_mode = #tpu.pipeline_mode<synchronous>, transform_indices = @transform_4, window_bounds = array<i64: 32, 3>}, {pipeline_mode = #tpu.pipeline_mode<synchronous>, transform_indices = @transform_5, window_bounds = array<i64: 32, 3>}, {pipeline_mode = #tpu.pipeline_mode<synchronous>, transform_indices = @transform_6, window_bounds = array<i64: 32, 32>}, {pipeline_mode = #tpu.pipeline_mode<synchronous>, transform_indices = @transform_7, window_bounds = array<i64: 32, 1>}, {pipeline_mode = #tpu.pipeline_mode<synchronous>, transform_indices = @transform_8, window_bounds = array<i64: 16, 32>}, {pipeline_mode = #tpu.pipeline_mode<synchronous>, transform_indices = @transform_9, window_bounds = array<i64: 16, 1>}, {pipeline_mode = #tpu.pipeline_mode<synchronous>, transform_indices = @transform_10, window_bounds = array<i64: 16, 1>}, {transform_indices = @transform_11, window_bounds = array<i64: 2>}, {transform_indices = @transform_12, window_bounds = array<i64: 1, 128>}]} {
    %c0 = arith.constant 0 : index
    %c0_0 = arith.constant 0 : index
    %0 = vector.load %arg1[%c0, %c0_0] : memref<48x128xf32, #tpu.memory_space<vmem>>, vector<48x128xf32>
    %c0_1 = arith.constant 0 : index
    %c0_2 = arith.constant 0 : index
    %1 = vector.load %arg2[%c0_1, %c0_2] : memref<48x128xf32, #tpu.memory_space<vmem>>, vector<48x128xf32>
    %2 = arith.mulf %0, %1 : vector<48x128xf32>
    %cst = arith.constant dense<0.000000e+00> : vector<128xf32>
    %3 = vector.multi_reduction <add>, %2, %cst [0] : vector<48x128xf32> to vector<128xf32>
    %4 = vector.shape_cast %3 : vector<128xf32> to vector<1x128xf32>
    %c0_3 = arith.constant 0 : index
    %c0_4 = arith.constant 0 : index
    %5 = vector.load %arg3[%c0_3, %c0_4] : memref<4x128xf32, #tpu.memory_space<vmem>>, vector<4x128xf32>
    %cst_5 = arith.constant dense<0.000000e+00> : vector<128xf32>
    %6 = vector.multi_reduction <add>, %5, %cst_5 [0] : vector<4x128xf32> to vector<128xf32>
    %7 = vector.shape_cast %6 : vector<128xf32> to vector<1x128xf32>
    %c0_6 = arith.constant 0 : index
    %c0_7 = arith.constant 0 : index
    %8 = vector.load %arg4[%c0_6, %c0_7] : memref<32x128xf32, #tpu.memory_space<vmem>>, vector<32x128xf32>
    %c0_8 = arith.constant 0 : index
    %c0_9 = arith.constant 0 : index
    %9 = vector.load %arg5[%c0_8, %c0_9] : memref<32x3xf32, #tpu.memory_space<vmem>>, vector<32x3xf32>
    %c0_10 = arith.constant 0 : index
    %c0_11 = arith.constant 0 : index
    %10 = vector.load %arg6[%c0_10, %c0_11] : memref<32x3xf32, #tpu.memory_space<vmem>>, vector<32x3xf32>
    %11 = vector.extract_strided_slice %9 {offsets = [0, 0], sizes = [32, 1], strides = [1, 1]} : vector<32x3xf32> to vector<32x1xf32>
    %12 = vector.extract_strided_slice %10 {offsets = [0, 0], sizes = [32, 1], strides = [1, 1]} : vector<32x3xf32> to vector<32x1xf32>
    %13 = vector.broadcast %11 : vector<32x1xf32> to vector<32x128xf32>
    %14 = arith.mulf %8, %13 : vector<32x128xf32>
    %cst_12 = arith.constant dense<0.000000e+00> : vector<128xf32>
    %15 = vector.multi_reduction <add>, %14, %cst_12 [0] : vector<32x128xf32> to vector<128xf32>
    %16 = vector.shape_cast %15 : vector<128xf32> to vector<1x128xf32>
    %17 = vector.broadcast %16 : vector<1x128xf32> to vector<32x128xf32>
    %18 = arith.mulf %8, %17 : vector<32x128xf32>
    %19 = vector.broadcast %12 : vector<32x1xf32> to vector<32x128xf32>
    %20 = arith.addf %18, %19 : vector<32x128xf32>
    %21 = arith.addf %20, %8 : vector<32x128xf32>
    %22 = vector.extract_strided_slice %9 {offsets = [0, 1], sizes = [32, 1], strides = [1, 1]} : vector<32x3xf32> to vector<32x1xf32>
    %23 = vector.extract_strided_slice %10 {offsets = [0, 1], sizes = [32, 1], strides = [1, 1]} : vector<32x3xf32> to vector<32x1xf32>
    %24 = vector.broadcast %22 : vector<32x1xf32> to vector<32x128xf32>
    %25 = arith.mulf %21, %24 : vector<32x128xf32>
    %cst_13 = arith.constant dense<0.000000e+00> : vector<128xf32>
    %26 = vector.multi_reduction <add>, %25, %cst_13 [0] : vector<32x128xf32> to vector<128xf32>
    %27 = vector.shape_cast %26 : vector<128xf32> to vector<1x128xf32>
    %28 = vector.broadcast %27 : vector<1x128xf32> to vector<32x128xf32>
    %29 = arith.mulf %8, %28 : vector<32x128xf32>
    %30 = vector.broadcast %23 : vector<32x1xf32> to vector<32x128xf32>
    %31 = arith.addf %29, %30 : vector<32x128xf32>
    %32 = arith.addf %31, %21 : vector<32x128xf32>
    %33 = vector.extract_strided_slice %9 {offsets = [0, 2], sizes = [32, 1], strides = [1, 1]} : vector<32x3xf32> to vector<32x1xf32>
    %34 = vector.extract_strided_slice %10 {offsets = [0, 2], sizes = [32, 1], strides = [1, 1]} : vector<32x3xf32> to vector<32x1xf32>
    %35 = vector.broadcast %33 : vector<32x1xf32> to vector<32x128xf32>
    %36 = arith.mulf %32, %35 : vector<32x128xf32>
    %cst_14 = arith.constant dense<0.000000e+00> : vector<128xf32>
    %37 = vector.multi_reduction <add>, %36, %cst_14 [0] : vector<32x128xf32> to vector<128xf32>
    %38 = vector.shape_cast %37 : vector<128xf32> to vector<1x128xf32>
    %39 = vector.broadcast %38 : vector<1x128xf32> to vector<32x128xf32>
    %40 = arith.mulf %8, %39 : vector<32x128xf32>
    %41 = vector.broadcast %34 : vector<32x1xf32> to vector<32x128xf32>
    %42 = arith.addf %40, %41 : vector<32x128xf32>
    %43 = arith.addf %42, %32 : vector<32x128xf32>
    %c0_15 = arith.constant 0 : index
    %c0_16 = arith.constant 0 : index
    %44 = vector.load %arg7[%c0_15, %c0_16] : memref<32x32xf32, #tpu.memory_space<vmem>>, vector<32x32xf32>
    %cst_17 = arith.constant dense<0.000000e+00> : vector<32x128xf32>
    %45 = tpu.matmul %44, %43, %cst_17 {dimension_numbers = #tpu.dot_dimension_numbers<[1], [0], [0], [1], [0, 0, 1, 1], [], []>} : vector<32x32xf32>, vector<32x128xf32>, vector<32x128xf32> -> vector<32x128xf32>
    %c0_18 = arith.constant 0 : index
    %c0_19 = arith.constant 0 : index
    %46 = vector.load %arg8[%c0_18, %c0_19] : memref<32x1xf32, #tpu.memory_space<vmem>>, vector<32x1xf32>
    %47 = vector.broadcast %46 : vector<32x1xf32> to vector<32x128xf32>
    %48 = arith.addf %45, %47 : vector<32x128xf32>
    %cst_20 = arith.constant 0.000000e+00 : f32
    %49 = vector.broadcast %cst_20 : f32 to vector<32x128xf32>
    %50 = arith.maximumf %48, %49 : vector<32x128xf32>
    %c0_21 = arith.constant 0 : index
    %c0_22 = arith.constant 0 : index
    %51 = vector.load %arg9[%c0_21, %c0_22] : memref<16x32xf32, #tpu.memory_space<vmem>>, vector<16x32xf32>
    %cst_23 = arith.constant dense<0.000000e+00> : vector<16x128xf32>
    %52 = tpu.matmul %51, %50, %cst_23 {dimension_numbers = #tpu.dot_dimension_numbers<[1], [0], [0], [1], [0, 0, 1, 1], [], []>} : vector<16x32xf32>, vector<32x128xf32>, vector<16x128xf32> -> vector<16x128xf32>
    %c0_24 = arith.constant 0 : index
    %c0_25 = arith.constant 0 : index
    %53 = vector.load %arg10[%c0_24, %c0_25] : memref<16x1xf32, #tpu.memory_space<vmem>>, vector<16x1xf32>
    %54 = vector.broadcast %53 : vector<16x1xf32> to vector<16x128xf32>
    %55 = arith.addf %52, %54 : vector<16x128xf32>
    %cst_26 = arith.constant 0.000000e+00 : f32
    %56 = vector.broadcast %cst_26 : f32 to vector<16x128xf32>
    %57 = arith.maximumf %55, %56 : vector<16x128xf32>
    %c0_27 = arith.constant 0 : index
    %c0_28 = arith.constant 0 : index
    %58 = vector.load %arg11[%c0_27, %c0_28] : memref<16x1xf32, #tpu.memory_space<vmem>>, vector<16x1xf32>
    %59 = vector.broadcast %58 : vector<16x1xf32> to vector<16x128xf32>
    %60 = arith.mulf %59, %57 : vector<16x128xf32>
    %cst_29 = arith.constant dense<0.000000e+00> : vector<128xf32>
    %61 = vector.multi_reduction <add>, %60, %cst_29 [0] : vector<16x128xf32> to vector<128xf32>
    %62 = vector.shape_cast %61 : vector<128xf32> to vector<1x128xf32>
    %c0_30 = arith.constant 0 : index
    %63 = memref.load %arg12[%c0_30] : memref<2xf32, #tpu.memory_space<smem>>
    %c1 = arith.constant 1 : index
    %64 = memref.load %arg12[%c1] : memref<2xf32, #tpu.memory_space<smem>>
    %65 = arith.addf %7, %4 : vector<1x128xf32>
    %66 = vector.broadcast %63 : f32 to vector<1x128xf32>
    %67 = arith.mulf %66, %65 : vector<1x128xf32>
    %68 = vector.broadcast %64 : f32 to vector<1x128xf32>
    %69 = arith.addf %67, %68 : vector<1x128xf32>
    %70 = arith.addf %69, %62 : vector<1x128xf32>
    %c0_31 = arith.constant 0 : index
    %c0_32 = arith.constant 0 : index
    %71 = vector.load %arg13[%c0_31, %c0_32] : memref<1x128xf32, #tpu.memory_space<vmem>>, vector<1x128xf32>
    tpu.vector_store %arg13[%c0_31, %c0_32], %70 {strides = array<i32>} : memref<1x128xf32, #tpu.memory_space<vmem>>, vector<1x128xf32>,
    return
  }
  func.func @transform_0(%arg0: i32) -> (i32, i32) {
    %c0_i32 = arith.constant 0 : i32
    %c0_i32_0 = arith.constant 0 : i32
    return %c0_i32, %arg0 : i32, i32
  }
  func.func @transform_1(%arg0: i32) -> (i32, i32) {
    %c0_i32 = arith.constant 0 : i32
    %c0_i32_0 = arith.constant 0 : i32
    return %c0_i32, %arg0 : i32, i32
  }
  func.func @transform_2(%arg0: i32) -> (i32, i32) {
    %c0_i32 = arith.constant 0 : i32
    %c0_i32_0 = arith.constant 0 : i32
    return %c0_i32, %arg0 : i32, i32
  }
  func.func @transform_3(%arg0: i32) -> (i32, i32) {
    %c0_i32 = arith.constant 0 : i32
    %c0_i32_0 = arith.constant 0 : i32
    return %c0_i32, %arg0 : i32, i32
  }
  func.func @transform_4(%arg0: i32) -> (i32, i32) {
    %c0_i32 = arith.constant 0 : i32
    %c0_i32_0 = arith.constant 0 : i32
    %c0_i32_1 = arith.constant 0 : i32
    return %c0_i32, %c0_i32_0 : i32, i32
  }
  func.func @transform_5(%arg0: i32) -> (i32, i32) {
    %c0_i32 = arith.constant 0 : i32
    %c0_i32_0 = arith.constant 0 : i32
    %c0_i32_1 = arith.constant 0 : i32
    return %c0_i32, %c0_i32_0 : i32, i32
  }
  func.func @transform_6(%arg0: i32) -> (i32, i32) {
    %c0_i32 = arith.constant 0 : i32
    %c0_i32_0 = arith.constant 0 : i32
    %c0_i32_1 = arith.constant 0 : i32
    return %c0_i32, %c0_i32_0 : i32, i32
  }
  func.func @transform_7(%arg0: i32) -> (i32, i32) {
    %c0_i32 = arith.constant 0 : i32
    %c0_i32_0 = arith.constant 0 : i32
    %c0_i32_1 = arith.constant 0 : i32
    return %c0_i32, %c0_i32_0 : i32, i32
  }
  func.func @transform_8(%arg0: i32) -> (i32, i32) {
    %c0_i32 = arith.constant 0 : i32
    %c0_i32_0 = arith.constant 0 : i32
    %c0_i32_1 = arith.constant 0 : i32
    return %c0_i32, %c0_i32_0 : i32, i32
  }
  func.func @transform_9(%arg0: i32) -> (i32, i32) {
    %c0_i32 = arith.constant 0 : i32
    %c0_i32_0 = arith.constant 0 : i32
    %c0_i32_1 = arith.constant 0 : i32
    return %c0_i32, %c0_i32_0 : i32, i32
  }
  func.func @transform_10(%arg0: i32) -> (i32, i32) {
    %c0_i32 = arith.constant 0 : i32
    %c0_i32_0 = arith.constant 0 : i32
    %c0_i32_1 = arith.constant 0 : i32
    return %c0_i32, %c0_i32_0 : i32, i32
  }
  func.func @transform_11(%arg0: i32) -> i32 {
    %c0_i32 = arith.constant 0 : i32
    %c0_i32_0 = arith.constant 0 : i32
    return %c0_i32 : i32
  }
  func.func @transform_12(%arg0: i32) -> (i32, i32) {
    %c0_i32 = arith.constant 0 : i32
    %c0_i32_0 = arith.constant 0 : i32
    return %c0_i32, %arg0 : i32, i32
  }
}

</mosaic_0001>

<bundles_post_ra>
// kernel: tpu_custom_call.1
= control target key start
LH: loop header
LB: loop body
LE: loop exit
PB: predicated region body
PF: predicated region fallthrough
CT: control target
= control target key end

     0   :  { %s2017_s0 = inlined_call_operand.vmem [shape: f32[48,256], index: 0, kind: input, shape index: {}]   ;;  %s2018_s1 = inlined_call_operand.hbm [shape: f32[48,256], index: 1, kind: input, shape index: {}]   ;;  %s2019_s2 = inlined_call_operand.hbm [shape: f32[4,256], index: 2, kind: input, shape index: {}]   ;;  %s2020_s3 = inlined_call_operand.hbm [shape: f32[32,256], index: 3, kind: input, shape index: {}]   ;;  %s2021_s4 = inlined_call_operand.vmem [shape: f32[32,3], index: 4, kind: input, shape index: {}]   ;;  %s2022_s5 = inlined_call_operand.vmem [shape: f32[32,3], index: 5, kind: input, shape index: {}]   ;;  %s2023_s6 = inlined_call_operand.vmem [shape: f32[32,32], index: 6, kind: input, shape index: {}]   ;;  %s2024_s7 = inlined_call_operand.vmem [shape: f32[32,1], index: 7, kind: input, shape index: {}]   ;;  %s2025_s8 = inlined_call_operand.vmem [shape: f32[16,32], index: 8, kind: input, shape index: {}]   ;;  %s2026_s9 = inlined_call_operand.vmem [shape: f32[16,1], index: 9, kind: input, shape index: {}]   ;;  %s2027_s10 = inlined_call_operand.vmem [shape: f32[16,1], index: 10, kind: input, shape index: {}]   ;;  %s2028_s11 = inlined_call_operand.vmem [shape: f32[2], index: 11, kind: input, shape index: {}]   ;;  %s2029_s12 = inlined_call_operand.hbm [shape: f32[1,256], index: 12, kind: output, shape index: {}]  }
   0x1   :  { %2043 = sst [smem:[#allocation23_spill]] %s2017_s0 }
   0x2   :  { %2044 = sst [smem:[#allocation24_spill]] %s2019_s2 }
   0x3   :  { %2045 = sst [smem:[#allocation25_spill]] %s2028_s11 }
   0x4   :  { %2046 = sst [smem:[#allocation26_spill]] %s2029_s12 }
   0x5   :  { %17 = vsyncpa [#allocation4], 0 }
   0x6   :  { %19 = vsyncpa [#allocation4 + $0x1], 0 }
   0x7   :  { %20 = vsyncpa [#allocation8], 0 }
   0x8   :  { %22 = vsyncpa [#allocation8 + $0x1], 0 }
   0x9   :  { %23 = vsyncpa [#allocation6], 0 }
   0xa   :  { %24 = vsyncpa [#allocation5], 0 }
   0xb   :  { %26 = vsyncpa [#allocation5 + $0x1], 0  ;;  %s1632_s21 = smov 0   ;;  %s1634_s22 = smov 0  }
   0xc   :  { %s1636_s23 = smov 0   ;;  %s1638_s24 = smov 0  }
   0xd LB: > { %2047 = sst [smem:[#allocation16_spill]] %s1542_s21  ;;  %s1653_s25 = sadd.s32 4294967295, %s1554_s24   ;;  %s1554_s24 = sphi %s1638_s24, %s2073_s24   ;;  %s1550_s23 = sphi %s1636_s23, %s2075_s23   ;;  %s1546_s22 = sphi %s1634_s22, %s2077_s22   ;;  %s1542_s21 = sphi %s1632_s21, %s2076_s21  }
   0xe   : > { %2048 = sst [smem:[#allocation17_spill]] %s1550_s23  ;;  %s1229_s26 = sadd.s32 4294967294, %s1554_s24  }
   0xf   : > { %2049 = sst [smem:[#allocation18_spill]] %s1554_s24  ;;  %s1657_s27 = sadd.s32 1, %s1554_s24  }
  0x10   : > { %2050 = sst [smem:[#allocation19_spill]] %s1657_s27  ;;  %s39_s28 = sadd.s32 1, %s1550_s23 }
  0x11   : > { %s36_s29 = ssub.s32 %s1554_s24, %s1657_s27  ;;  %p46_p0 = scmp.ne.s32.totalorder %s1550_s23, %s1546_s22 }
  0x12   : > { %p37_p1 = scmp.eq.s32.totalorder %s36_s29, 0  ;;  %p47_p2 = scmp.eq.s32.totalorder %s1554_s24, 0 }
  0x13   : > { %p78_p3 = scmp.ne.s32.totalorder %s1546_s22, %s1542_s21  ;;  %p2039_p4 = scmp.eq.s32.totalorder %s1653_s25, 0 }
  0x14   : > { %s1669_s30 = scalar_select %p37_p1, %s1550_s23, %s39_s28  }
  0x15   : > { %p1671_p5 = por %p47_p2, %p46_p0  ;;  %p1677_p6 = por %p2039_p4, %p78_p3 }
  0x16   : > { %2051 = sst [smem:[#allocation20_spill]] %s1669_s30  ;;  %p322_p7 = scmp.eq.s32.totalorder %s1653_s25, 1 }
  0x17   : > { %s2053_s14 = scalar_select %p1677_p6, 1, 0 }
  0x18   : > { %p328_p8 = scmp.eq.s32.totalorder %s1229_s26, 1  ;;  %p1230_p9 = scmp.ge.s32.totalorder %s1554_s24, 1 }
  0x19   : > { %p335_p10 = scmp.lt.s32.totalorder %s1554_s24, 3  ;;  %p1684_p11 = por %p322_p7, %p46_p0 }
  0x1a   : > { %p1688_p12 = por %p328_p8, %p78_p3  ;;  %s2059_s11 = sld [smem:[#allocation25_spill]] }
  0x1b   : > { %s2054_s15 = scalar_select %p1684_p11, 1, 0 }
  0x1c   : > { %s2056_s16 = scalar_select %p1688_p12, 1, 0 }
  0x1d   : > { %2055 = sst [smem:[#allocation21_spill]] %s2054_s15  ;;  %p1692_p13 = pnand %p1230_p9, %p335_p10 }
  0x1e   : > { %2057 = sst [smem:[#allocation22_spill]] %s2056_s16 }
  0x1f   : > { %p1323_p1 = pneg %p1692_p13 }
  0x20   : > { %s369_s20 = sshll.u32 %s2059_s11, 4  ;;  %s370_s20 = int_to_ptr.vmem [resolvable:$true] %s369_s20 }
  0x21   : > { %p1324_p0 = pnand %p1323_p1, %p2039_p4  ;;  %s1381_s26 = scalar_lea.vmem %s370_s20, 16 }
  0x22   : > { %p1382_p2 = scmp.ne.s32.totalorder %s370_s20, %s1381_s26  ;;  %p1389_p12 = scmp.lt.s32.totalorder %s370_s20, %s370_s20 }
  0x23   : > { %p1383_p3 = pneg %p1324_p0  ;;  %p1390_p9 = scmp.lt.s32.totalorder %s1381_s26, %s1381_s26 }
  0x25   : > { %p1384_p7 = pnand %p1383_p3, %p1382_p2  ;;  %p1391_p10 = por %p1390_p9, %p1389_p12 }
  0x27   : > { %p1385_p8 = pneg %p1384_p7 }
  0x29   : > { %p1392_p11 = pnand %p1391_p10, %p1385_p8 }
  0x2b   : > { %1395 = shalt.err (!%p1392_p11)
}
  0x2c   : > { %s1556_s28 = smov [#allocation10]   ;;  %p2038_p6 = scmp.ge.s32.totalorder %s1554_s24, 2 }
  0x2d   : > { %1326 = dma.vmem_to_smem (!%p1324_p0), %s370_s20, 16, %s1556_s28, [#allocation6]  }
  0x2e   : > { %376 = sbr.rel (%p2038_p6) target bundleno = 145 (0x91), region = 48 }
  0x35   : > { %379 = sbr.rel (!%p1671_p5) target bundleno = 66 (0x42), region = 52  ;;  %s381_s29 = sand.u32 (%p1671_p5), 1, %s1550_s23  }
  0x36   : > { %s1233_s18 = sshll.u32 (%p1671_p5), %s1554_s24, 3  ;;  %s1308_s19 = smul.u32 (%p1671_p5), 48, %s381_s29 }
  0x37   : > { %s2060_s0 = sld [smem:[#allocation23_spill]] (%p1671_p5) }
  0x38   : > { %s383_s20 = scalar_lea.vmem (%p1671_p5), [#allocation2], %s1308_s19 }
  0x3d   : > { %s385_s30 = scalar_lea.vmem %s2060_s0, %s1233_s18 }
  0x3e   : > { %v423_v0 = vld [vmem:[%s385_s30] sm:$0xff]  ;;  %v425_v1 = vld [vmem:[%s385_s30 + $0x10] sm:$0xff] }
  0x3f   : > { %v427_v2 = vld [vmem:[%s385_s30 + $0x20] sm:$0xff]  ;;  %v429_v3 = vld [vmem:[%s385_s30 + $0x30] sm:$0xff]  ;;  %424 = vst [vmem:[%s383_s20] sm:$0xff] %v423_v0  ;;  %426 = vst [vmem:[%s383_s20 + $0x8] sm:$0xff] %v425_v1 }
  0x40   : > { %v431_v4 = vld [vmem:[%s385_s30 + $0x40] sm:$0xff]  ;;  %v433_v5 = vld [vmem:[%s385_s30 + $0x50] sm:$0xff]  ;;  %428 = vst [vmem:[%s383_s20 + $0x10] sm:$0xff] %v427_v2  ;;  %430 = vst [vmem:[%s383_s20 + $0x18] sm:$0xff] %v429_v3 }
  0x41   : > { %432 = vst [vmem:[%s383_s20 + $0x20] sm:$0xff] %v431_v4  ;;  %434 = vst [vmem:[%s383_s20 + $0x28] sm:$0xff] %v433_v5 }
  0x42 PF: > { %s1714_s11 = sand.u32 1, %s1550_s23   ;;  %s461_s28 = sand.u32 1, %s1554_s24  }
  0x43   : > { %s1235_s29 = sshll.u32 %s1714_s11, 2  ;;  %s1236_s18 = sshll.u32 %s1554_s24, 6 }
  0x44   : > { %s2061_s2 = sld [smem:[#allocation24_spill]]  ;;  %s465_s20 = scalar_lea.vmem [#allocation7], %s1235_s29 }
  0x45   : > { %s472_s0 = sshll.u32 %s465_s20, 4  ;;  %s1237_s23 = sshll.u32 %s1714_s11, 5  ;;  %s1724_s0 = int_to_ptr.vmem [resolvable:$true] %s472_s0 }
  0x46   : > { %s1727_s27 = scalar_lea.sflag [#allocation8], %s461_s28 }
  0x4a   : > { %s1722_s26 = scalar_lea.hbm %s2061_s2, %s1236_s18  ;;  %s1400_s18 = scalar_lea.hbm %s2061_s2, 128 }
  0x4b   : > { %s1396_s16 = scalar_lea.hbm %s1722_s26, 64  ;;  %p1401_p0 = scmp.lt.u32.totalorder %s1722_s26, %s2061_s2 }
  0x4c   : > { %p1397_p11 = scmp.ne.s32.totalorder %s1722_s26, %s1396_s16  ;;  %p1402_p2 = scmp.lt.u32.totalorder %s1400_s18, %s1396_s16 }
  0x4d   : > { %p1404_p7 = scmp.lt.u32.totalorder %s1396_s16, %s1722_s26 }
  0x4e   : > { %p1398_p12 = pnand %p1397_p11, %p1671_p5  ;;  %p1403_p3 = por %p1402_p2, %p1401_p0 }
  0x50   : > { %p1399_p1 = pneg %p1398_p12  ;;  %p1405_p8 = por %p1404_p7, %p1403_p3 }
  0x52   : > { %p1406_p9 = pnand %p1405_p8, %p1399_p1 }
  0x54   : > { %1409 = shalt.err (!%p1406_p9)
}
  0x55   : > { %s1410_s28 = scalar_lea.vmem %s1724_s0, 64  ;;  %s1557_s21 = smov [#allocation7]  }
  0x56   : > { %p1411_p10 = scmp.ne.s32.totalorder %s1724_s0, %s1410_s28  ;;  %s1414_s29 = sshll.u32 %s1557_s21, 4  ;;  %s1415_s29 = int_to_ptr.vmem [resolvable:$false] %s1414_s29 }
  0x57   : > { %s1416_s12 = scalar_lea.vmem %s1415_s29, 128  ;;  %p1417_p6 = scmp.lt.s32.totalorder %s1724_s0, %s1415_s29 }
  0x58   : > { %p1412_p11 = pnand %p1411_p10, %p1671_p5  ;;  %p1418_p4 = scmp.lt.s32.totalorder %s1416_s12, %s1410_s28 }
  0x5a   : > { %p1413_p12 = pneg %p1412_p11  ;;  %p1419_p0 = por %p1418_p4, %p1417_p6 }
  0x5c   : > { %p1420_p2 = pnand %p1419_p0, %p1413_p12 }
  0x5e   : > { %1423 = shalt.err (!%p1420_p2)
}
  0x5f   : > { %1314 = dma.hbm_to_vmem [thread:$0]  (%p1671_p5), %s1722_s26, 64, %s1724_s0, %s1727_s27  }
  0x60   : > { %s483_s16 = scalar_lea.vmem [#allocation9], %s1237_s23  ;;  %s1309_s30 = smul.u32 48, %s1714_s11 }
  0x61   : > { %s489_s20 = sshll.u32 %s483_s16, 4  ;;  %s1234_s18 = sshll.u32 %s1554_s24, 7  ;;  %s1754_s20 = int_to_ptr.vmem [resolvable:$true] %s489_s20 }
  0x62   : > { %s1760_s21 = scalar_lea.hbm %s2018_s1, %s1234_s18  ;;  %s445_s29 = scalar_lea.vmem [#allocation3], %s1309_s30 }
  0x63   : > { %s451_s12 = sshll.u32 %s445_s29, 4  ;;  %s1767_s26 = scalar_lea.hbm %s2020_s3, %s1234_s18  ;;  %s1762_s12 = int_to_ptr.vmem [resolvable:$true] %s451_s12 }
  0x64   : > { %s442_s16 = scalar_lea.sflag [#allocation4], %s1714_s11  ;;  %s1424_s2 = scalar_lea.hbm %s1760_s21, 768 }
  0x65   : > { %p1425_p4 = scmp.ne.s32.totalorder %s1760_s21, %s1424_s2  ;;  %s1428_s24 = scalar_lea.hbm %s2018_s1, 1536 }
  0x66   : > { %p1429_p3 = scmp.lt.u32.totalorder %s1760_s21, %s2018_s1  ;;  %p1430_p7 = scmp.lt.u32.totalorder %s1428_s24, %s1424_s2 }
  0x67   : > { %p1426_p6 = pnand %p1425_p4, %p1671_p5  ;;  %p1432_p9 = scmp.lt.u32.totalorder %s1424_s2, %s1760_s21 }
  0x68   : > { %p1431_p8 = por %p1430_p7, %p1429_p3 }
  0x69   : > { %p1427_p1 = pneg %p1426_p6 }
  0x6a   : > { %p1433_p10 = por %p1432_p9, %p1431_p8 }
  0x6c   : > { %p1434_p11 = pnand %p1433_p10, %p1427_p1 }
  0x6e   : > { %1437 = shalt.err (!%p1434_p11)
}
  0x6f   : > { %s1438_s18 = scalar_lea.vmem %s1762_s12, 768  ;;  %s1558_s29 = smov [#allocation3]  }
  0x70   : > { %p1439_p12 = scmp.ne.s32.totalorder %s1762_s12, %s1438_s18  ;;  %s1442_s0 = sshll.u32 %s1558_s29, 4  ;;  %s1443_s0 = int_to_ptr.vmem [resolvable:$false] %s1442_s0 }
  0x71   : > { %s1444_s15 = scalar_lea.vmem %s1443_s0, 1536  ;;  %p1445_p4 = scmp.lt.s32.totalorder %s1762_s12, %s1443_s0 }
  0x72   : > { %p1440_p0 = pnand %p1439_p12, %p1671_p5  ;;  %p1446_p6 = scmp.lt.s32.totalorder %s1444_s15, %s1438_s18 }
  0x74   : > { %p1441_p2 = pneg %p1440_p0  ;;  %p1447_p3 = por %p1446_p6, %p1445_p4 }
  0x76   : > { %p1448_p7 = pnand %p1447_p3, %p1441_p2 }
  0x78   : > { %1451 = shalt.err (!%p1448_p7)
}
  0x79   : > { %s1559_s2 = smov 256   ;;  %s1560_s24 = smov 128  }
  0x7a   : > { %s1561_s23 = smov 8   ;;  %s1452_s19 = scalar_lea.hbm %s1767_s26, 512 }
  0x7b   : > { %1313 = dma.hbm_to_vmem [thread:$0]  (%p1671_p5), %s1760_s21, 768, %s1762_s12, %s442_s16, %s1559_s2, %s1560_s24, %s1561_s23  }
  0x7c   : > { %p1453_p1 = scmp.ne.s32.totalorder %s1767_s26, %s1452_s19  ;;  %s1456_s18 = scalar_lea.hbm %s2020_s3, 1024 }
  0x7d   : > { %p1457_p10 = scmp.lt.u32.totalorder %s1767_s26, %s2020_s3  ;;  %p1458_p11 = scmp.lt.u32.totalorder %s1456_s18, %s1452_s19 }
  0x7e   : > { %p1454_p8 = pnand %p1453_p1, %p1671_p5  ;;  %p1460_p0 = scmp.lt.u32.totalorder %s1452_s19, %s1767_s26 }
  0x7f   : > { %p1459_p12 = por %p1458_p11, %p1457_p10 }
  0x80   : > { %p1455_p9 = pneg %p1454_p8 }
  0x81   : > { %p1461_p2 = por %p1460_p0, %p1459_p12 }
  0x83   : > { %p1462_p4 = pnand %p1461_p2, %p1455_p9 }
  0x85   : > { %1465 = shalt.err (!%p1462_p4)
}
  0x86   : > { %s1466_s11 = scalar_lea.vmem %s1754_s20, 512  ;;  %s1562_s21 = smov [#allocation9]  }
  0x87   : > { %p1467_p6 = scmp.ne.s32.totalorder %s1754_s20, %s1466_s11  ;;  %s1470_s12 = sshll.u32 %s1562_s21, 4  ;;  %s1471_s12 = int_to_ptr.vmem [resolvable:$false] %s1470_s12 }
  0x88   : > { %s1472_s16 = scalar_lea.vmem %s1471_s12, 1024  ;;  %p1473_p1 = scmp.lt.s32.totalorder %s1754_s20, %s1471_s12 }
  0x89   : > { %p1468_p3 = pnand %p1467_p6, %p1671_p5  ;;  %p1474_p8 = scmp.lt.s32.totalorder %s1472_s16, %s1466_s11 }
  0x8b   : > { %p1469_p7 = pneg %p1468_p3  ;;  %p1475_p10 = por %p1474_p8, %p1473_p1 }
  0x8d   : > { %p1476_p11 = pnand %p1475_p10, %p1469_p7 }
  0x8f   : > { %1479 = shalt.err (!%p1476_p11)
}
  0x90   : > { %1315 = dma.hbm_to_vmem [thread:$0]  (%p1671_p5), %s1767_s26, 512, %s1754_s20, %s1727_s27, %s1559_s2, %s1560_s24, %s1561_s23  }
  0x91 PF: > { %501 = sbr.rel (%p1692_p13) target bundleno = 860 (0x35c), region = 102  ;;  %s1824_s15 = sand.u32 (!%p1692_p13), 1, %s1546_s22  }
  0x92   : > { %s1310_s19 = smul.u32 (!%p1692_p13), 48, %s1824_s15  ;;  %s511_s13 = scalar_lea.sflag (!%p1692_p13), [#allocation4], %s1824_s15 }
  0x93   : > { %p2062_p9 = scmp.ne.s32.totalorder (!%p1692_p13), %s2053_s14, 0 }
  0x94   : > { %s1827_s28 = scalar_lea.vmem (!%p1692_p13), [#allocation2], %s1310_s19  ;;  %s1830_s30 = scalar_lea.vmem (!%p1692_p13), [#allocation3], %s1310_s19 }
  0x98   : > { %1525 = dma.done.wait (%p2062_p9), %s511_s13, 768  }
  0x99   : > { %1527 = vsyncadd (%p2062_p9), %s511_s13, 4294966528  ;;  %s519_s27 = sand.u32 1, %s1653_s25   ;;  %s1240_s17 = sshll.u32 %s1824_s15, 2 }
  0x9a   : > { %s520_s20 = scalar_lea.sflag [#allocation8], %s519_s27  ;;  %s1838_s26 = scalar_lea.vmem [#allocation7], %s1240_s17 }
  0x9b   : > { %1529 = dma.done.wait (%p2062_p9), %s520_s20, 576  }
  0x9c   : > { %1531 = vsyncadd (%p2062_p9), %s520_s20, 4294966720  ;;  %s1241_s2 = sshll.u32 %s1824_s15, 5  ;;  %p2063_p5 = scmp.eq.s32.totalorder %s1653_s25, 0 }
  0x9d   : > { %s1845_s24 = scalar_lea.vmem [#allocation9], %s1241_s2 }
  0x9e   : > { %1533 = dma.done.wait (%p2063_p5), [#allocation6], 16   ;;  %p2064_p13 = pmov %p2063_p5 }
  0xa0   : > { %1535 = vsyncadd (%p2064_p13), [#allocation6], 4294967280 }
  0xa1   : > { %541 = sfence }
  0xa2   : > { %v635_v6 = vld [vmem:[%s2021_s4 + $0x10] sm:$0xff]  ;;  %v633_v7 = vld [vmem:[%s2021_s4] sm:$0xff]  ;;  %v1563_v8 = vmov 0   ;;  %v636_v9 = vld [vmem:[%s2021_s4 + $0x18] sm:$0xff]  ;;  %v1564_v15 = vmov 1   ;;  %v1565_v16 = vmov 2  }
  0xa3   : > { %1374 = vset.pattern.permute.xlu1 %v1563_v8  ;;  %1373 = vset.pattern.permute.xlu0 %v1563_v8  ;;  %v634_v10 = vld [vmem:[%s2021_s4 + $0x8] sm:$0xff]  ;;  %v637_v12 = vld [vmem:[%s2022_s5] sm:$0xff]  ;;  %v640_v13 = vld [vmem:[%s2022_s5 + $0x18] sm:$0xff]  ;;  %vm848_vm0 = vcmask 261120   ;;  %vm621_vm1 = vcmask 1043456   ;;  %s1250_s20 = sshll.u32 %s1653_s25, 4 }
  0xa4   : > { %653 = vperm.xlu1 %1374, %v635_v6   ;;  %643 = vperm.xlu0 %1373, %v633_v7   ;;  %v638_v11 = vld [vmem:[%s2022_s5 + $0x8] sm:$0xff]  ;;  %v639_v14 = vld [vmem:[%s2022_s5 + $0x10] sm:$0xff]  ;;  %v820_v17 = vld [vmem:[%s2023_s6] sm:$0xff]  ;;  %s590_s2 = scalar_lea.vmem [#allocation11], %s1824_s15  ;;  %s2066_s0 = sld [smem:[#allocation26_spill]] }
  0xa5   : > { %1275 = vmatprep.mubr.msk.f32.mxu0 %vm848_vm0, %v820_v17  ;;  %v825_v18 = vld [vmem:[%s2024_s7 + $0x8] sm:$0xff]  ;;  %v824_v19 = vld [vmem:[%s2024_s7] sm:$0xff]  ;;  %v826_v20 = vld [vmem:[%s2024_s7 + $0x10] sm:$0xff]  ;;  %s1090_s23 = sshll.u32 %s590_s2, 4  ;;  %s1078_s14 = scalar_lea.sflag [#allocation5], %s1824_s15  ;;  %s1975_s23 = int_to_ptr.vmem [resolvable:$true] %s1090_s23 }
  0xa6   : > { %v827_v21 = vld [vmem:[%s2024_s7 + $0x18] sm:$0xff]  ;;  %v952_v22 = vld [vmem:[%s2026_s9] sm:$0xff]  ;;  %v953_v23 = vld [vmem:[%s2026_s9 + $0x8] sm:$0xff]  ;;  %s1480_s11 = scalar_lea.vmem %s1975_s23, 16  ;;  %s1566_s25 = smov [#allocation11]  }
  0xa7   : > { %v1047_v24 = vld [vmem:[%s2027_s10] sm:$0xff]  ;;  %v1048_v25 = vld [vmem:[%s2027_s10 + $0x8] sm:$0xff]  ;;  %v1907_v29 = vld [vmem:[%s1845_s24 + $0x8] sm:$0xff]  ;;  %p1481_p12 = scmp.ne.s32.totalorder %s1975_s23, %s1480_s11  ;;  %s1484_s21 = sshll.u32 %s1566_s25, 4  ;;  %s1485_s21 = int_to_ptr.vmem [resolvable:$false] %s1484_s21 }
  0xa8   : > { %658 = vperm.xlu1 %1374, %v636_v9   ;;  %648 = vperm.xlu0 %1373, %v634_v10   ;;  %v1904_v28 = vld [vmem:[%s1845_s24] sm:$0xff]  ;;  %v1910_v30 = vld [vmem:[%s1845_s24 + $0x10] sm:$0xff]  ;;  %v1915_v35 = vld [vmem:[%s1845_s24 + $0x18] sm:$0xff]  ;;  %s1486_s12 = scalar_lea.vmem %s1485_s21, 32  ;;  %p1487_p6 = scmp.lt.s32.totalorder %s1975_s23, %s1485_s21 }
  0xa9   : > { %p1488_p3 = scmp.lt.s32.totalorder %s1486_s12, %s1480_s11 }
  0xaa   : > { %s1973_s24 = scalar_lea.hbm %s2066_s0, %s1250_s20 }
  0xab   : > { %p1489_p7 = por %p1488_p3, %p1487_p6 }
  0xac   : > { %685 = vperm.xlu1 %1374, %v638_v11   ;;  %680 = vperm.xlu0 %1373, %v637_v12  }
  0xb0   : > { %695 = vperm.xlu1 %1374, %v640_v13   ;;  %690 = vperm.xlu0 %1373, %v639_v14  }
  0xb4   : > { %1376 = vset.pattern.permute.xlu1 %v1564_v15  ;;  %1375 = vset.pattern.permute.xlu0 %v1564_v15 }
  0xb5   : > { %711 = vperm.xlu1 %1376, %v634_v10   ;;  %707 = vperm.xlu0 %1375, %v633_v7  }
  0xb9   : > { %715 = vperm.xlu1 %1376, %v635_v6   ;;  %719 = vperm.xlu0 %1375, %v636_v9  }
  0xbd   : > { %740 = vperm.xlu1 %1376, %v637_v12   ;;  %744 = vperm.xlu0 %1375, %v638_v11  }
  0xc1   : > { %748 = vperm.xlu1 %1376, %v639_v14   ;;  %752 = vperm.xlu0 %1375, %v640_v13  }
  0xc5   : > { %1377 = vset.pattern.permute.xlu1 %v1565_v16  ;;  %1378 = vset.pattern.permute.xlu0 %v1565_v16 }
  0xc6   : > { %764 = vperm.xlu1 %1377, %v633_v7   ;;  %768 = vperm.xlu0 %1378, %v634_v10  }
  0xca   : > { %772 = vperm.xlu1 %1377, %v635_v6   ;;  %797 = vperm.xlu0 %1378, %v637_v12  }
  0xce   : > { %776 = vperm.xlu1 %1377, %v636_v9   ;;  %805 = vperm.xlu0 %1378, %v639_v14  }
  0xd2   : > { %801 = vperm.xlu1 %1377, %v638_v11   ;;  %1379 = vset.pattern.permute.xlu0 %v1563_v8 }
  0xd3   : > { %830 = vperm.xlu0 %1379, %v824_v19  }
  0xd6   : > { %809 = vperm.xlu1 %1377, %v640_v13  }
  0xd7   : > { %845 = vperm.xlu0 %1379, %v827_v21  }
  0xda   : > { %1380 = vset.pattern.permute.xlu1 %v1563_v8 }
  0xdb   : > { %835 = vperm.xlu1 %1380, %v825_v18   ;;  %961 = vperm.xlu0 %1379, %v953_v23  }
  0xdf   : > { %840 = vperm.xlu1 %1380, %v826_v20   ;;  %1056 = vperm.xlu0 %1379, %v1048_v25  }
  0xe3   : > { %956 = vperm.xlu1 %1380, %v952_v22  }
  0xe7   : > { %1051 = vperm.xlu1 %1380, %v1047_v24  }
 0x123   : > { %v654_v26 = vpop.permute.xlu1 %653  ;;  %v644_v27 = vpop.permute.xlu0 %643 }
 0x124   : > { %v661_v32 = vmul.f32 %v644_v27, %v1904_v28  ;;  %v663_v36 = vmul.f32 %v654_v26, %v1910_v30 }
 0x127   : > { %v649_v31 = vpop.permute.xlu0 %648  ;;  %v659_v34 = vpop.permute.xlu1 %658 }
 0x128   : > { %v662_v33 = vmul.f32 %v649_v31, %v1907_v29  ;;  %v664_v38 = vmul.f32 %v659_v34, %v1915_v35 }
 0x12a   : > { %v665_v37 = vadd.f32 %v662_v33, %v661_v32 }
 0x12b   : > { %v686_v42 = vpop.permute.xlu1 %685  ;;  %v681_v45 = vpop.permute.xlu0 %680 }
 0x12c   : > { %v666_v39 = vadd.f32 %v665_v37, %v663_v36 }
 0x12e   : > { %v667_v40 = vadd.f32 %v666_v39, %v664_v38 }
 0x12f   : > { %v696_v47 = vpop.permute.xlu1 %695  ;;  %v691_v50 = vpop.permute.xlu0 %690 }
 0x130   : > { %v668_v41 = vrot.slane %v667_v40, 4 }
 0x132   : > { %v669_v43 = vadd.f32 %v668_v41, %v667_v40 }
 0x134   : > { %v670_v44 = vrot.slane %v669_v43, 2  ;;  %v712_v55 = vpop.permute.xlu1 %711  ;;  %v708_v60 = vpop.permute.xlu0 %707 }
 0x136   : > { %v671_v46 = vadd.f32 %v670_v44, %v669_v43 }
 0x138   : > { %v672_v48 = vrot.slane %v671_v46, 1  ;;  %v716_v3 = vpop.permute.xlu1 %715  ;;  %v720_v6 = vpop.permute.xlu0 %719 }
 0x13a   : > { %v673_v49 = vadd.f32 %v672_v48, %v671_v46 }
 0x13c   : > { %v675_v51 = vmul.f32 %v673_v49, %v1907_v29  ;;  %v674_v52 = vmul.f32 %v673_v49, %v1904_v28  ;;  %v677_v53 = vmul.f32 %v673_v49, %v1915_v35  ;;  %v676_v54 = vmul.f32 %v673_v49, %v1910_v30  ;;  %v741_v10 = vpop.permute.xlu1 %740  ;;  %v745_v16 = vpop.permute.xlu0 %744 }
 0x13e   : > { %v699_v56 = vadd.f32 %v686_v42, %v675_v51  ;;  %v698_v57 = vadd.f32 %v681_v45, %v674_v52  ;;  %v701_v58 = vadd.f32 %v696_v47, %v677_v53  ;;  %v700_v59 = vadd.f32 %v691_v50, %v676_v54 }
 0x140   : > { %v703_v61 = vadd.f32 %v699_v56, %v1907_v29  ;;  %v702_v62 = vadd.f32 %v698_v57, %v1904_v28  ;;  %v704_v63 = vadd.f32 %v700_v59, %v1910_v30  ;;  %v705_v2 = vadd.f32 %v701_v58, %v1915_v35  ;;  %v749_v14 = vpop.permute.xlu1 %748  ;;  %v753_v24 = vpop.permute.xlu0 %752 }
 0x142   : > { %v723_v0 = vmul.f32 %v712_v55, %v703_v61  ;;  %v722_v1 = vmul.f32 %v708_v60, %v702_v62  ;;  %v724_v5 = vmul.f32 %v716_v3, %v704_v63  ;;  %v725_v8 = vmul.f32 %v720_v6, %v705_v2 }
 0x144   : > { %v726_v4 = vadd.f32 %v723_v0, %v722_v1 }
 0x145   : > { %v765_v18 = vpop.permute.xlu1 %764  ;;  %v769_v37 = vpop.permute.xlu0 %768 }
 0x146   : > { %v727_v7 = vadd.f32 %v726_v4, %v724_v5 }
 0x148   : > { %v728_v9 = vadd.f32 %v727_v7, %v725_v8 }
 0x149   : > { %v773_v32 = vpop.permute.xlu1 %772  ;;  %v798_v52 = vpop.permute.xlu0 %797 }
 0x14a   : > { %v729_v11 = vrot.slane %v728_v9, 4 }
 0x14c   : > { %v730_v12 = vadd.f32 %v729_v11, %v728_v9 }
 0x14d   : > { %v777_v43 = vpop.permute.xlu1 %776  ;;  %v806_v60 = vpop.permute.xlu0 %805 }
 0x14e   : > { %v731_v13 = vrot.slane %v730_v12, 2 }
 0x150   : > { %v732_v15 = vadd.f32 %v731_v13, %v730_v12 }
 0x151   : > { %v802_v51 = vpop.permute.xlu1 %801 }
 0x152   : > { %v733_v17 = vrot.slane %v732_v15, 1  ;;  %v831_v7 = vpop.permute.xlu0 %830 }
 0x154   : > { %v734_v19 = vadd.f32 %v733_v17, %v732_v15 }
 0x155   : > { %v810_v59 = vpop.permute.xlu1 %809 }
 0x156   : > { %v735_v20 = vmul.f32 %v734_v19, %v1904_v28  ;;  %v736_v21 = vmul.f32 %v734_v19, %v1907_v29  ;;  %v737_v22 = vmul.f32 %v734_v19, %v1910_v30  ;;  %v738_v23 = vmul.f32 %v734_v19, %v1915_v35 }
 0x158   : > { %v755_v25 = vadd.f32 %v741_v10, %v735_v20  ;;  %v756_v26 = vadd.f32 %v745_v16, %v736_v21  ;;  %v757_v27 = vadd.f32 %v749_v14, %v737_v22  ;;  %v758_v31 = vadd.f32 %v753_v24, %v738_v23  ;;  %v846_v14 = vpop.permute.xlu0 %845 }
 0x15a   : > { %v759_v33 = vadd.f32 %v755_v25, %v702_v62  ;;  %v761_v34 = vadd.f32 %v757_v27, %v704_v63  ;;  %v760_v36 = vadd.f32 %v756_v26, %v703_v61  ;;  %v762_v39 = vadd.f32 %v758_v31, %v705_v2  ;;  %v836_v8 = vpop.permute.xlu1 %835  ;;  %v951_v25 = vld [vmem:[%s2025_s8 + $0x8] sm:$0xff]  ;;  %v591_v26 = vld [vmem:[%s1827_s28] sm:$0xff] }
 0x15b   : > { %v592_v27 = vld [vmem:[%s1827_s28 + $0x8] sm:$0xff]  ;;  %v597_v31 = vld [vmem:[%s1830_s30] sm:$0xff] }
 0x15c   : > { %v779_v38 = vmul.f32 %v765_v18, %v759_v33  ;;  %v780_v40 = vmul.f32 %v769_v37, %v760_v36  ;;  %v781_v41 = vmul.f32 %v773_v32, %v761_v34  ;;  %v782_v44 = vmul.f32 %v777_v43, %v762_v39  ;;  %v598_v32 = vld [vmem:[%s1830_s30 + $0x8] sm:$0xff]  ;;  %v599_v37 = vld [vmem:[%s1830_s30 + $0x10] sm:$0xff] }
 0x15e   : > { %v783_v42 = vadd.f32 %v780_v40, %v779_v38  ;;  %v841_v17 = vpop.permute.xlu1 %840  ;;  %v594_v40 = vld [vmem:[%s1827_s28 + $0x18] sm:$0xff] }
 0x160   : > { %v784_v45 = vadd.f32 %v783_v42, %v781_v41  ;;  %v600_v41 = vld [vmem:[%s1830_s30 + $0x18] sm:$0xff] }
 0x161   : > { %v606_v42 = vmul.f32 %v600_v41, %v594_v40 }
 0x162   : > { %v785_v46 = vadd.f32 %v784_v45, %v782_v44  ;;  %v595_v44 = vld [vmem:[%s1827_s28 + $0x20] sm:$0xff] }
 0x163   : > { %v601_v45 = vld [vmem:[%s1830_s30 + $0x20] sm:$0xff] }
 0x164   : > { %v786_v47 = vrot.slane %v785_v46, 4 }
 0x166   : > { %v787_v48 = vadd.f32 %v786_v47, %v785_v46  ;;  %v607_v46 = vmul.f32 %v601_v45, %v595_v44 }
 0x168   : > { %v788_v49 = vrot.slane %v787_v48, 2 }
 0x16a   : > { %v789_v50 = vadd.f32 %v788_v49, %v787_v48  ;;  %v596_v48 = vld [vmem:[%s1827_s28 + $0x28] sm:$0xff] }
 0x16b   : > { %v602_v49 = vld [vmem:[%s1830_s30 + $0x28] sm:$0xff]  ;;  %s1249_s30 = sld [smem:[#allocation10 + $0x1]] }
 0x16c   : > { %v790_v53 = vrot.slane %v789_v50, 1 }
 0x16e   : > { %v791_v54 = vadd.f32 %v790_v53, %v789_v50  ;;  %v608_v50 = vmul.f32 %v602_v49, %v596_v48 }
 0x170   : > { %v795_v55 = vmul.f32 %v791_v54, %v1915_v35  ;;  %v792_v56 = vmul.f32 %v791_v54, %v1904_v28  ;;  %v794_v57 = vmul.f32 %v791_v54, %v1910_v30  ;;  %v793_v58 = vmul.f32 %v791_v54, %v1907_v29  ;;  %v821_v28 = vld [vmem:[%s2023_s6 + $0x8] sm:$0xff]  ;;  %v822_v29 = vld [vmem:[%s2023_s6 + $0x10] sm:$0xff]  ;;  %v823_v30 = vld [vmem:[%s2023_s6 + $0x18] sm:$0xff] }
 0x171   : > { %v950_v35 = vld [vmem:[%s2025_s8] sm:$0xff] }
 0x172   : > { %v815_v61 = vadd.f32 %v810_v59, %v795_v55  ;;  %v812_v62 = vadd.f32 %v798_v52, %v792_v56  ;;  %v814_v63 = vadd.f32 %v806_v60, %v794_v57  ;;  %v813_v0 = vadd.f32 %v802_v51, %v793_v58  ;;  %1289 = vmatprep.mubr.msk.f32.mxu1 %vm848_vm0, %v950_v35  ;;  %v620_v52 = vld [vmem:[%s1838_s26] sm:$0xf]  ;;  %s2065_s26 = sld [smem:[#allocation21_spill]] }
 0x173   : > { %v622_v54 = vsel %vm621_vm1, %v620_v52, 0.0 }
 0x174   : > { %v819_v1 = vadd.f32 %v815_v61, %v762_v39  ;;  %v816_v2 = vadd.f32 %v812_v62, %v759_v33  ;;  %v818_v3 = vadd.f32 %v814_v63, %v761_v34  ;;  %v817_v4 = vadd.f32 %v813_v0, %v760_v36  ;;  %v593_v36 = vld [vmem:[%s1827_s28 + $0x10] sm:$0xff]  ;;  %v962_v61 = vpop.permute.xlu0 %961  ;;  %v957_v0 = vpop.permute.xlu1 %956  ;;  %s1068_s28 = sld [smem:[#allocation10]] }
 0x175   : > { %v603_v33 = vmul.f32 %v597_v31, %v591_v26  ;;  %v604_v34 = vmul.f32 %v598_v32, %v592_v27  ;;  %v605_v38 = vmul.f32 %v599_v37, %v593_v36  ;;  %v623_v56 = vrot.slane %v622_v54, 4 }
 0x176   : > { %v1292_v5 = vpack.c.bf16 %v817_v4, %v816_v2  ;;  %v1296_v6 = vpack.c.bf16 %v819_v1, %v818_v3 }
 0x177   : > { %v609_v39 = vadd.f32 %v604_v34, %v603_v33  ;;  %v624_v58 = vadd.f32 %v623_v56, %v622_v54 }
 0x178   : > { %1293 = vmatprep.subr.bf16.mxu0 %v1292_v5  ;;  %v1052_v35 = vpop.permute.xlu1 %1051  ;;  %p2067_p0 = scmp.ne.s32.totalorder %s2065_s26, 0 }
 0x179   : > { %1295 = vmatpush3.bf16.msra.mxu0 %v1292_v5  ;;  %v610_v43 = vadd.f32 %v609_v39, %v605_v38  ;;  %v625_v60 = vrot.slane %v624_v58, 2 }
 0x17a   : > { %1297 = vmatprep.subr.bf16.mxu0 %v1296_v6  ;;  %p1482_p2 = pnand %p1481_p12, %p2067_p0 }
 0x17b   : > { %v611_v47 = vadd.f32 %v610_v43, %v606_v42  ;;  %v626_v63 = vadd.f32 %v625_v60, %v624_v58 }
 0x17c   : > { %p1483_p4 = pneg %p1482_p2 }
 0x17d   : > { %1299 = vmatpush3.bf16.msra.mxu0 %v1296_v6  ;;  %v612_v51 = vadd.f32 %v611_v47, %v607_v46  ;;  %v627_v6 = vrot.slane %v626_v63, 1 }
 0x17e   : > { %p1490_p1 = pnand %p1489_p7, %p1483_p4 }
 0x17f   : > { %v613_v53 = vadd.f32 %v612_v51, %v608_v50 }
 0x180   : > { %1276 = vmatmul.mubr.msk.f32.vlgmr.msra.gmra.mrb[0].mxu0 %vm848_vm0, %v821_v28 }
 0x181   : > { %1278 = vmatprep.mubr.msk.f32.mxu0 %vm848_vm0, %v822_v29  ;;  %v614_v55 = vrot.slane %v613_v53, 4  ;;  %v1057_v29 = vpop.permute.xlu0 %1056 }
 0x183   : > { %v615_v57 = vadd.f32 %v614_v55, %v613_v53 }
 0x184   : > { %1279 = vmatmul.mubr.msk.f32.gmra.mrb[2].mxu0 %vm848_vm0, %v823_v30 }
 0x185   : > { %v616_v59 = vrot.slane %v615_v57, 2 }
 0x187   : > { %v617_v62 = vadd.f32 %v616_v59, %v615_v57 }
 0x189   : > { %v618_v5 = vrot.slane %v617_v62, 1 }
 0x253   : > { %v1277_v9 = vpop.f32.mrb[0].mxu0 }
 0x254   : > { %v933_v10 = vadd.f32 %v1277_v9, %v836_v8  ;;  %v927_v11 = vpop.f32.mrb[1].mxu0  ;;  %v619_v9 = vadd.f32 %v618_v5, %v617_v62 }
 0x255   : > { %v928_v12 = vadd.f32 %v927_v11, %v831_v7 }
 0x256   : > { %v947_v13 = vmax.f32 %v933_v10, 0.0  ;;  %v628_v10 = vadd.f32 %v627_v6, %v626_v63 }
 0x257   : > { %v946_v15 = vmax.f32 %v928_v12, 0.0  ;;  %v1280_v16 = vpop.f32.mrb[2].mxu0 }
 0x258   : > { %v943_v18 = vadd.f32 %v1280_v16, %v846_v14  ;;  %v937_v19 = vpop.f32.mrb[3].mxu0  ;;  %v1071_v14 = vstv %s1068_s28 }
 0x259   : > { %v938_v20 = vadd.f32 %v937_v19, %v841_v17  ;;  %v1300_v21 = vpack.c.bf16 %v947_v13, %v946_v15  ;;  %v1070_v13 = vadd.f32 %v628_v10, %v619_v9 }
 0x25a   : > { %v949_v22 = vmax.f32 %v943_v18, 0.0  ;;  %v1073_v18 = vstv %s1249_s30 }
 0x25b   : > { %v948_v23 = vmax.f32 %v938_v20, 0.0  ;;  %1301 = vmatprep.subr.bf16.mxu1 %v1300_v21  ;;  %v1072_v17 = vmul.f32 %v1071_v14, %v1070_v13 }
 0x25c   : > { %1303 = vmatpush3.bf16.msra.mxu1 %v1300_v21 }
 0x25d   : > { %v1304_v24 = vpack.c.bf16 %v949_v22, %v948_v23  ;;  %v1074_v21 = vadd.f32 %v1073_v18, %v1072_v17 }
 0x25f   : > { %1305 = vmatprep.subr.bf16.mxu1 %v1304_v24 }
 0x260   : > { %1307 = vmatpush3.bf16.msra.mxu1 %v1304_v24 }
 0x263   : > { %1290 = vmatmul.mubr.msk.f32.vlgmr.msra.gmra.mrb[0].mxu1 %vm848_vm0, %v951_v25 }
 0x336   : > { %v1291_v1 = vpop.f32.mrb[0].mxu1 }
 0x337   : > { %v1042_v2 = vadd.f32 %v1291_v1, %v962_v61  ;;  %v1036_v3 = vpop.f32.mrb[1].mxu1 }
 0x338   : > { %v1037_v4 = vadd.f32 %v1036_v3, %v957_v0 }
 0x339   : > { %v1046_v28 = vmax.f32 %v1042_v2, 0.0 }
 0x33a   : > { %v1045_v30 = vmax.f32 %v1037_v4, 0.0 }
 0x33b   : > { %v1060_v7 = vmul.f32 %v1057_v29, %v1046_v28 }
 0x33c   : > { %v1059_v8 = vmul.f32 %v1052_v35, %v1045_v30 }
 0x33e   : > { %v1061_v11 = vadd.f32 %v1060_v7, %v1059_v8 }
 0x340   : > { %v1062_v12 = vrot.slane %v1061_v11, 4 }
 0x342   : > { %v1063_v15 = vadd.f32 %v1062_v12, %v1061_v11 }
 0x344   : > { %v1064_v16 = vrot.slane %v1063_v15, 2 }
 0x346   : > { %v1065_v19 = vadd.f32 %v1064_v16, %v1063_v15 }
 0x348   : > { %v1066_v20 = vrot.slane %v1065_v19, 1 }
 0x34a   : > { %v1067_v22 = vadd.f32 %v1066_v20, %v1065_v19 }
 0x34c   : > { %v1075_v23 = vadd.f32 %v1074_v21, %v1067_v22 }
 0x34e   : > { %1076 = vst [vmem:[%s590_s2] sm:$0x1] %v1075_v23 }
 0x34f   : > { %1493 = shalt.err (!%p1490_p1)
}
 0x350   : > { %s1494_s15 = scalar_lea.hbm %s1973_s24, 16  ;;  %s1498_s13 = scalar_lea.hbm %s2066_s0, 32 }
 0x351   : > { %p1495_p8 = scmp.ne.s32.totalorder %s1973_s24, %s1494_s15  ;;  %p1499_p9 = scmp.lt.u32.totalorder %s1973_s24, %s2066_s0 }
 0x352   : > { %p1500_p5 = scmp.lt.u32.totalorder %s1498_s13, %s1494_s15  ;;  %p1502_p12 = scmp.lt.u32.totalorder %s1494_s15, %s1973_s24 }
 0x353   : > { %p1496_p10 = pnand %p1495_p8, %p2067_p0 }
 0x354   : > { %p1501_p13 = por %p1500_p5, %p1499_p9 }
 0x355   : > { %p1497_p11 = pneg %p1496_p10 }
 0x356   : > { %p1503_p2 = por %p1502_p12, %p1501_p13 }
 0x358   : > { %p1504_p4 = pnand %p1503_p2, %p1497_p11 }
 0x35a   : > { %1507 = shalt.err (!%p1504_p4)
}
 0x35b   : > { %1321 = dma.vmem_to_hbm [thread:$0]  (%p2067_p0), %s1975_s23, 16, %s1973_s24, %s1078_s14  }
 0x35c PF: > { %s2068_s28 = sld [smem:[#allocation16_spill]]  ;;  %s2069_s30 = sld [smem:[#allocation22_spill]] }
 0x35d   : > { %s2070_s20 = sld [smem:[#allocation18_spill]] }
 0x362   : > { %s1102_s2 = sand.u32 1, %s2068_s28   ;;  %p2071_p6 = scmp.ne.s32.totalorder %s2069_s30, 0 }
 0x363   : > { %p2072_p3 = scmp.ge.s32.totalorder %s2070_s20, 2  ;;  %s1103_s18 = scalar_lea.sflag [#allocation5], %s1102_s2 }
 0x365   : > { %p1328_p7 = pnand %p2072_p3, %p2071_p6 }
 0x367   : > { %1537 = dma.done.wait (!%p1328_p7), %s1103_s18, 16  }
 0x368   : > { %1539 = vsyncadd (!%p1328_p7), %s1103_s18, 4294967280  ;;  %s2073_s24 = sld [smem:[#allocation19_spill]]  ;;  %s2074_s29 = sld [smem:[#allocation17_spill]] }
 0x369   : > { %s2075_s23 = sld [smem:[#allocation20_spill]]  ;;  %s2076_s21 = smov %s1546_s22 }
 0x36e   : > { %p29_p1 = scmp.ge.s32.totalorder %s2073_s24, 4   ;;  %s2077_s22 = smov %s2074_s29 }
 0x370   :  { %31 = sbr.rel (!%p29_p1) target bundleno = 13 (0xd), region = 188 }
 0x377   :  { %1107 = vsyncpa [#allocation4], 1 }
 0x378   :  { %1109 = vsyncpa [#allocation4 + $0x1], 1 }
 0x379   :  { %1110 = vsyncpa [#allocation8], 1 }
 0x37a   :  { %1112 = vsyncpa [#allocation8 + $0x1], 1 }
 0x37b   :  { %1113 = vsyncpa [#allocation5], 1 }
 0x37c   :  { %1115 = vsyncpa [#allocation5 + $0x1], 1 }
 0x37d   :  { %1116 = vsyncpa [#allocation6], 1 }
 0x37e   :  { %1118 = vsyncpa [#allocation6 + $0x1], 1 }

</bundles_post_ra>
